<compile_context>
chip_gen: v7x
topology: tpu7x:2x2x1
jax: 0.10.0
libtpu: 0.0.40
codegen_flags: <defaults>
</compile_context>

<pallas_src>
import functools

import jax
import jax.numpy as jnp
from jax.experimental import pallas as pl
from jax.experimental.pallas import tpu as pltpu

LANE = 128


def _make_kernel(emit_attention: bool):
    def kernel(x_ref, w1_ref, b1_ref, w2_ref, b2_ref,
               wf1_ref, bf1_ref, wf2_ref, bf2_ref,
               out_ref, *attn_out):
        bs, t, fp = x_ref.shape                 # fp is a multiple of 128 (lane-dense)
        x = x_ref[...]                          # (bs, t, fp) f32
        x2 = x.reshape(bs * t, fp)              # tile-aligned merge of leading dims

        # --- self_anttention: Linear(f, 64) -> Tanh -> Linear(64, 3) ---
        h = jnp.tanh(
            jnp.dot(x2, w1_ref[...], preferred_element_type=jnp.float32) + b1_ref[...]
        )                                                       # (bs*t, 64)
        scores = (
            jnp.dot(h, w2_ref[...], preferred_element_type=jnp.float32) + b2_ref[...]
        ).reshape(bs, t, 3)                                     # (bs, t, 3)

        # --- nn.Softmax2d() on a 3-D tensor: softmax over dim -3 (the batch dim) ---
        mx = jnp.max(scores, axis=0, keepdims=True)
        e = jnp.exp(scores - mx)
        # NOTE: at production sizes pl.reciprocal(denom, approx=True) would move the
        # divide onto the otherwise-idle EUP; kept exact here for tight validation.
        attn = e / jnp.sum(e, axis=0, keepdims=True)            # (bs, t, 3)
        # nn.Dropout(0.3): identity in eval mode.
        if emit_attention:
            attn_out[0][...] = attn

        # --- attention-weighted temporal pooling, all 3 heads in one fused pass ---
        # pooled[b, k, :] == (x * attn[:, :, k:k+1]).sum(axis=1); lane-dense result.
        pooled = jnp.sum(attn[:, :, :, None] * x[:, :, None, :], axis=1)  # (bs, 3, fp)

        # --- fc1 as three (fp, 32) slabs  ==  cat([m1, m2, m3], 1) @ W_fc1 ---
        h1 = (
            jnp.dot(pooled[:, 0, :], wf1_ref[0], preferred_element_type=jnp.float32)
            + jnp.dot(pooled[:, 1, :], wf1_ref[1], preferred_element_type=jnp.float32)
            + jnp.dot(pooled[:, 2, :], wf1_ref[2], preferred_element_type=jnp.float32)
            + bf1_ref[...]
        )                                                       # (bs, 32)

        # --- fc2 (zero-padded to 128 lanes) -> sigmoid; lane-dense store ---
        logit = (
            jnp.dot(h1, wf2_ref[...], preferred_element_type=jnp.float32) + bf2_ref[...]
        )                                                       # (bs, 128)
        out_ref[...] = jax.nn.sigmoid(logit)                    # column 0 is the output

    return kernel


def init_params(key, feature_size):
    ks = jax.random.split(key, 8)
    s = 0.1
    return dict(
        w1=jax.random.normal(ks[0], (feature_size, 64), jnp.float32) * s,
        b1=jax.random.normal(ks[1], (1, 64), jnp.float32) * s,
        w2=jax.random.normal(ks[2], (64, 3), jnp.float32) * s,
        b2=jax.random.normal(ks[3], (1, 3), jnp.float32) * s,
        wf1=jax.random.normal(ks[4], (feature_size * 3, 32), jnp.float32) * s,
        bf1=jax.random.normal(ks[5], (1, 32), jnp.float32) * s,
        wf2=jax.random.normal(ks[6], (32, 1), jnp.float32) * s,
        bf2=jax.random.normal(ks[7], (1, 1), jnp.float32) * s,
    )


def prepare_params(params, feature_size):
    """One-time layout prep (call once, outside the hot path):
    * pad the feature axis of w1 to a multiple of 128 lanes,
    * split fc1's weight into three (f_pad, 32) slabs,
    * zero-pad fc2's weight/bias to 128 output lanes (lane-dense final store)."""
    f = feature_size
    fp = pl.cdiv(f, LANE) * LANE
    w1_p = jnp.pad(params["w1"], ((0, fp - f), (0, 0)))            # (fp, 64)
    wf1_r = params["wf1"].reshape(3, f, 32)                        # slab k = rows [k*f:(k+1)*f]
    wf1_p = jnp.pad(wf1_r, ((0, 0), (0, fp - f), (0, 0)))          # (3, fp, 32)
    wf2_p = jnp.pad(params["wf2"], ((0, 0), (0, LANE - 1)))        # (32, 128)
    bf2_p = jnp.pad(params["bf2"], ((0, 0), (0, LANE - 1)))        # (1, 128)
    return dict(
        w1=w1_p, b1=params["b1"], w2=params["w2"], b2=params["b2"],
        wf1=wf1_p, bf1=params["bf1"], wf2=wf2_p, bf2=bf2_p,
    )


@functools.partial(jax.jit, static_argnames=("return_attention",))
def self_attention_classifier(x, pp, return_attention=False):
    bs, t, f = x.shape
    fp = pp["w1"].shape[0]
    x_p = jnp.pad(x, ((0, 0), (0, 0), (0, fp - f))) if fp != f else x

    vmem = pl.BlockSpec(memory_space=pltpu.MemorySpace.VMEM)
    out_shapes = [jax.ShapeDtypeStruct((bs, LANE), jnp.float32)]
    out_specs = [vmem]
    if return_attention:
        out_shapes.append(jax.ShapeDtypeStruct((bs, t, 3), jnp.float32))
        out_specs.append(vmem)

    flops = (2 * bs * t * fp * 64            # x @ W1
             + 2 * bs * t * 64 * 3           # h @ W2
             + 2 * bs * t * 3 * fp           # pooling
             + 3 * 2 * bs * fp * 32          # fc1 (three slabs)
             + 2 * bs * 32 * LANE)           # fc2 (lane-padded)
    transcendentals = bs * t * 64 + bs * t * 3 + bs * LANE
    param_elems = fp * 64 + 64 + 64 * 3 + 3 + 3 * fp * 32 + 32 + 32 * LANE + LANE
    out_elems = bs * LANE + (bs * t * 3 if return_attention else 0)
    bytes_accessed = 4 * (bs * t * fp + param_elems + out_elems)

    results = pl.pallas_call(
        _make_kernel(return_attention),
        out_shape=tuple(out_shapes),
        in_specs=[vmem] * 9,
        out_specs=tuple(out_specs),
        cost_estimate=pl.CostEstimate(
            flops=flops,
            transcendentals=transcendentals,
            bytes_accessed=bytes_accessed,
        ),
    )(x_p, pp["w1"], pp["b1"], pp["w2"], pp["b2"],
      pp["wf1"], pp["bf1"], pp["wf2"], pp["bf2"])

    y = results[0][:, 0]                       # == x.view(bs) in PyTorch
    if return_attention:
        return y, results[1]
    return y


def _reference(x, p):
    """Plain-JAX reference mirroring the PyTorch forward (eval mode)."""
    bs, t, f = x.shape
    h = jnp.tanh(x.reshape(bs * t, f) @ p["w1"] + p["b1"])
    scores = (h @ p["w2"] + p["b2"]).reshape(bs, t, 3)
    attn = jax.nn.softmax(scores, axis=0)                 # Softmax2d on 3-D -> dim -3
    m1 = jnp.sum(x * attn[:, :, 0:1], axis=1)
    m2 = jnp.sum(x * attn[:, :, 1:2], axis=1)
    m3 = jnp.sum(x * attn[:, :, 2:3], axis=1)
    mc = jnp.concatenate([m1, m2, m3], axis=1)
    logit = (mc @ p["wf1"] + p["bf1"]) @ p["wf2"] + p["bf2"]
    return jax.nn.sigmoid(logit).reshape(bs), attn


if __name__ == "__main__":
    key = jax.random.PRNGKey(0)
    k_x, k_p = jax.random.split(key)

    bs, t, feature_size = 2, 8, 32                        # args.feature_size = 32
    x = jax.random.normal(k_x, (bs, t, feature_size), jnp.float32)
    params = init_params(k_p, feature_size)
    pp = prepare_params(params, feature_size)             # one-time layout prep

    # Fast path: no attention output -> one fewer DMA writeback.
    y_fast = jax.block_until_ready(self_attention_classifier(x, pp))

    # Attention-returning path.
    y, attn = self_attention_classifier(x, pp, return_attention=True)
    y = jax.block_until_ready(y)
    attn = jax.block_until_ready(attn)

    y_ref, attn_ref = _reference(x, params)
    assert y.shape == (bs,)
    assert attn.shape == (bs, t, 3)
    assert jnp.allclose(y_fast, y_ref, atol=1e-5, rtol=1e-5), (y_fast, y_ref)
    assert jnp.allclose(y, y_ref, atol=1e-5, rtol=1e-5), (y, y_ref)
    assert jnp.allclose(attn, attn_ref, atol=1e-5, rtol=1e-5)

    print("KERNEL_OK")
</pallas_src>

<mosaic_0001>
module attributes {stable_mosaic.version = 11 : i64} {
  func.func @kernel(%arg0: memref<2x8x128xf32, #tpu.memory_space<vmem>>, %arg1: memref<128x64xf32, #tpu.memory_space<vmem>>, %arg2: memref<1x64xf32, #tpu.memory_space<vmem>>, %arg3: memref<64x3xf32, #tpu.memory_space<vmem>>, %arg4: memref<1x3xf32, #tpu.memory_space<vmem>>, %arg5: memref<3x128x32xf32, #tpu.memory_space<vmem>>, %arg6: memref<1x32xf32, #tpu.memory_space<vmem>>, %arg7: memref<32x128xf32, #tpu.memory_space<vmem>>, %arg8: memref<1x128xf32, #tpu.memory_space<vmem>>, %arg9: memref<2x128xf32, #tpu.memory_space<vmem>>) attributes {dimension_semantics = [], scalar_prefetch = 0 : i64, scratch_operands = 0 : i64, tpu.core_type = #tpu.core_type<tc>} {
    %c0 = arith.constant 0 : index
    %c0_0 = arith.constant 0 : index
    %c0_1 = arith.constant 0 : index
    %0 = vector.load %arg0[%c0, %c0_0, %c0_1] : memref<2x8x128xf32, #tpu.memory_space<vmem>>, vector<2x8x128xf32>
    %1 = vector.shape_cast %0 : vector<2x8x128xf32> to vector<16x128xf32>
    %c0_2 = arith.constant 0 : index
    %c0_3 = arith.constant 0 : index
    %2 = vector.load %arg1[%c0_2, %c0_3] : memref<128x64xf32, #tpu.memory_space<vmem>>, vector<128x64xf32>
    %cst = arith.constant dense<0.000000e+00> : vector<16x64xf32>
    %3 = tpu.matmul %1, %2, %cst {dimension_numbers = #tpu.dot_dimension_numbers<[1], [0], [0], [1], [0, 0, 1, 1], [], []>} : vector<16x128xf32>, vector<128x64xf32>, vector<16x64xf32> -> vector<16x64xf32>
    %c0_4 = arith.constant 0 : index
    %c0_5 = arith.constant 0 : index
    %4 = vector.load %arg2[%c0_4, %c0_5] : memref<1x64xf32, #tpu.memory_space<vmem>>, vector<1x64xf32>
    %5 = vector.broadcast %4 : vector<1x64xf32> to vector<16x64xf32>
    %6 = arith.addf %3, %5 : vector<16x64xf32>
    %7 = math.tanh %6 : vector<16x64xf32>
    %c0_6 = arith.constant 0 : index
    %c0_7 = arith.constant 0 : index
    %8 = vector.load %arg3[%c0_6, %c0_7] : memref<64x3xf32, #tpu.memory_space<vmem>>, vector<64x3xf32>
    %cst_8 = arith.constant dense<0.000000e+00> : vector<16x3xf32>
    %9 = tpu.matmul %7, %8, %cst_8 {dimension_numbers = #tpu.dot_dimension_numbers<[1], [0], [0], [1], [0, 0, 1, 1], [], []>} : vector<16x64xf32>, vector<64x3xf32>, vector<16x3xf32> -> vector<16x3xf32>
    %c0_9 = arith.constant 0 : index
    %c0_10 = arith.constant 0 : index
    %10 = vector.load %arg4[%c0_9, %c0_10] : memref<1x3xf32, #tpu.memory_space<vmem>>, vector<1x3xf32>
    %11 = vector.broadcast %10 : vector<1x3xf32> to vector<16x3xf32>
    %12 = arith.addf %9, %11 : vector<16x3xf32>
    %13 = vector.shape_cast %12 : vector<16x3xf32> to vector<2x8x3xf32>
    %cst_11 = arith.constant dense<0xFF800000> : vector<8x3xf32>
    %14 = vector.multi_reduction <maximumf>, %13, %cst_11 [0] : vector<2x8x3xf32> to vector<8x3xf32>
    %15 = vector.shape_cast %14 : vector<8x3xf32> to vector<1x8x3xf32>
    %16 = vector.broadcast %15 : vector<1x8x3xf32> to vector<2x8x3xf32>
    %17 = arith.subf %13, %16 : vector<2x8x3xf32>
    %18 = math.exp %17 : vector<2x8x3xf32>
    %cst_12 = arith.constant dense<0.000000e+00> : vector<8x3xf32>
    %19 = vector.multi_reduction <add>, %18, %cst_12 [0] : vector<2x8x3xf32> to vector<8x3xf32>
    %20 = vector.shape_cast %19 : vector<8x3xf32> to vector<1x8x3xf32>
    %21 = vector.broadcast %20 : vector<1x8x3xf32> to vector<2x8x3xf32>
    %22 = arith.divf %18, %21 : vector<2x8x3xf32>
    %23 = vector.shape_cast %22 : vector<2x8x3xf32> to vector<2x8x3x1xf32>
    %24 = vector.shape_cast %0 : vector<2x8x128xf32> to vector<2x8x1x128xf32>
    %25 = vector.broadcast %23 : vector<2x8x3x1xf32> to vector<2x8x3x128xf32>
    %26 = vector.broadcast %24 : vector<2x8x1x128xf32> to vector<2x8x3x128xf32>
    %27 = arith.mulf %25, %26 : vector<2x8x3x128xf32>
    %cst_13 = arith.constant dense<0.000000e+00> : vector<2x3x128xf32>
    %28 = vector.multi_reduction <add>, %27, %cst_13 [1] : vector<2x8x3x128xf32> to vector<2x3x128xf32>
    %29 = vector.extract_strided_slice %28 {offsets = [0, 0, 0], sizes = [2, 1, 128], strides = [1, 1, 1]} : vector<2x3x128xf32> to vector<2x1x128xf32>
    %30 = vector.shape_cast %29 : vector<2x1x128xf32> to vector<2x128xf32>
    %c0_14 = arith.constant 0 : index
    %c0_15 = arith.constant 0 : index
    %c0_16 = arith.constant 0 : index
    %31 = vector.load %arg5[%c0_14, %c0_15, %c0_16] : memref<3x128x32xf32, #tpu.memory_space<vmem>>, vector<1x128x32xf32>
    %32 = vector.shape_cast %31 : vector<1x128x32xf32> to vector<128x32xf32>
    %cst_17 = arith.constant dense<0.000000e+00> : vector<2x32xf32>
    %33 = tpu.matmul %30, %32, %cst_17 {dimension_numbers = #tpu.dot_dimension_numbers<[1], [0], [0], [1], [0, 0, 1, 1], [], []>} : vector<2x128xf32>, vector<128x32xf32>, vector<2x32xf32> -> vector<2x32xf32>
    %34 = vector.extract_strided_slice %28 {offsets = [0, 1, 0], sizes = [2, 1, 128], strides = [1, 1, 1]} : vector<2x3x128xf32> to vector<2x1x128xf32>
    %35 = vector.shape_cast %34 : vector<2x1x128xf32> to vector<2x128xf32>
    %c1 = arith.constant 1 : index
    %c0_18 = arith.constant 0 : index
    %c0_19 = arith.constant 0 : index
    %36 = vector.load %arg5[%c1, %c0_18, %c0_19] : memref<3x128x32xf32, #tpu.memory_space<vmem>>, vector<1x128x32xf32>
    %37 = vector.shape_cast %36 : vector<1x128x32xf32> to vector<128x32xf32>
    %cst_20 = arith.constant dense<0.000000e+00> : vector<2x32xf32>
    %38 = tpu.matmul %35, %37, %cst_20 {dimension_numbers = #tpu.dot_dimension_numbers<[1], [0], [0], [1], [0, 0, 1, 1], [], []>} : vector<2x128xf32>, vector<128x32xf32>, vector<2x32xf32> -> vector<2x32xf32>
    %39 = arith.addf %33, %38 : vector<2x32xf32>
    %40 = vector.extract_strided_slice %28 {offsets = [0, 2, 0], sizes = [2, 1, 128], strides = [1, 1, 1]} : vector<2x3x128xf32> to vector<2x1x128xf32>
    %41 = vector.shape_cast %40 : vector<2x1x128xf32> to vector<2x128xf32>
    %c2 = arith.constant 2 : index
    %c0_21 = arith.constant 0 : index
    %c0_22 = arith.constant 0 : index
    %42 = vector.load %arg5[%c2, %c0_21, %c0_22] : memref<3x128x32xf32, #tpu.memory_space<vmem>>, vector<1x128x32xf32>
    %43 = vector.shape_cast %42 : vector<1x128x32xf32> to vector<128x32xf32>
    %cst_23 = arith.constant dense<0.000000e+00> : vector<2x32xf32>
    %44 = tpu.matmul %41, %43, %cst_23 {dimension_numbers = #tpu.dot_dimension_numbers<[1], [0], [0], [1], [0, 0, 1, 1], [], []>} : vector<2x128xf32>, vector<128x32xf32>, vector<2x32xf32> -> vector<2x32xf32>
    %45 = arith.addf %39, %44 : vector<2x32xf32>
    %c0_24 = arith.constant 0 : index
    %c0_25 = arith.constant 0 : index
    %46 = vector.load %arg6[%c0_24, %c0_25] : memref<1x32xf32, #tpu.memory_space<vmem>>, vector<1x32xf32>
    %47 = vector.broadcast %46 : vector<1x32xf32> to vector<2x32xf32>
    %48 = arith.addf %45, %47 : vector<2x32xf32>
    %c0_26 = arith.constant 0 : index
    %c0_27 = arith.constant 0 : index
    %49 = vector.load %arg7[%c0_26, %c0_27] : memref<32x128xf32, #tpu.memory_space<vmem>>, vector<32x128xf32>
    %cst_28 = arith.constant dense<0.000000e+00> : vector<2x128xf32>
    %50 = tpu.matmul %48, %49, %cst_28 {dimension_numbers = #tpu.dot_dimension_numbers<[1], [0], [0], [1], [0, 0, 1, 1], [], []>} : vector<2x32xf32>, vector<32x128xf32>, vector<2x128xf32> -> vector<2x128xf32>
    %c0_29 = arith.constant 0 : index
    %c0_30 = arith.constant 0 : index
    %51 = vector.load %arg8[%c0_29, %c0_30] : memref<1x128xf32, #tpu.memory_space<vmem>>, vector<1x128xf32>
    %52 = vector.broadcast %51 : vector<1x128xf32> to vector<2x128xf32>
    %53 = arith.addf %50, %52 : vector<2x128xf32>
    %54 = arith.negf %53 : vector<2x128xf32>
    %55 = math.exp %54 : vector<2x128xf32>
    %cst_31 = arith.constant 1.000000e+00 : f32
    %56 = vector.broadcast %cst_31 : f32 to vector<2x128xf32>
    %57 = arith.addf %56, %55 : vector<2x128xf32>
    %58 = arith.divf %56, %57 : vector<2x128xf32>
    %c0_32 = arith.constant 0 : index
    %c0_33 = arith.constant 0 : index
    %59 = vector.load %arg9[%c0_32, %c0_33] : memref<2x128xf32, #tpu.memory_space<vmem>>, vector<2x128xf32>
    tpu.vector_store %arg9[%c0_32, %c0_33], %58 {strides = array<i32>} : memref<2x128xf32, #tpu.memory_space<vmem>>, vector<2x128xf32>,
    return
  }
}

</mosaic_0001>

<bundles_post_ra>
// kernel: self_attention_classifier.1
= control target key start
LH: loop header
LB: loop body
LE: loop exit
PB: predicated region body
PF: predicated region fallthrough
CT: control target
= control target key end

     0   :  { %vm149_vm0 = vcmask 523264   ;;  %vm231_vm1 = vcmask 23552   ;;  %v247_v62 = vlaneseq  ;;  %vm1405_vm2 = vmmov 0   ;;  %s1824_s1 = inlined_call_operand.vmem [shape: f32[128,64], index: 1, kind: input, shape index: {}]   ;;  %s1825_s0 = inlined_call_operand.vmem [shape: f32[2,8,128], index: 0, kind: input, shape index: {}]   ;;  %s1826_s3 = inlined_call_operand.vmem [shape: f32[64,3], index: 3, kind: input, shape index: {}]   ;;  %s1827_s2 = inlined_call_operand.vmem [shape: f32[1,64], index: 2, kind: input, shape index: {}]   ;;  %s1828_s4 = inlined_call_operand.vmem [shape: f32[1,3], index: 4, kind: input, shape index: {}]   ;;  %s1829_s5 = inlined_call_operand.vmem [shape: f32[3,128,32], index: 5, kind: input, shape index: {}]   ;;  %s1830_s7 = inlined_call_operand.vmem [shape: f32[32,128], index: 7, kind: input, shape index: {}]   ;;  %s1831_s6 = inlined_call_operand.vmem [shape: f32[1,32], index: 6, kind: input, shape index: {}]   ;;  %s1832_s8 = inlined_call_operand.vmem [shape: f32[1,128], index: 8, kind: input, shape index: {}]   ;;  %s1833_s9 = inlined_call_operand.vmem [shape: f32[2,128], index: 9, kind: output, shape index: {}]  }
   0x1   :  { %v34_v0 = vld [vmem:[%s1824_s1] sm:$0xff]  ;;  %v35_v1 = vld [vmem:[%s1824_s1 + $0x8] sm:$0xff]  ;;  %v36_v2 = vld [vmem:[%s1824_s1 + $0x10] sm:$0xff]  ;;  %vm555_vm3 = vcmask 1042432   ;;  %vm622_vm4 = vcmask 1041409   ;;  %vm879_vm5 = vcmask 261120  }
   0x2   :  { %v1258_v3 = vpack.c.bf16 %v35_v1, %v34_v0  ;;  %v37_v4 = vld [vmem:[%s1824_s1 + $0x18] sm:$0xff]  ;;  %v38_v6 = vld [vmem:[%s1824_s1 + $0x20] sm:$0xff]  ;;  %v39_v7 = vld [vmem:[%s1824_s1 + $0x28] sm:$0xff]  ;;  %v1552_v63 = vshrl.u32 %v247_v62, 7  ;;  %v1404_v0 = vmov 0.0|0.0  }
   0x3   :  { %v1262_v5 = vpack.c.bf16 %v37_v4, %v36_v2  ;;  %v1266_v8 = vpack.c.bf16 %v39_v7, %v38_v6  ;;  %v1479_v9 = vld [vmem:[%s1825_s0] sm:$0xff]  ;;  %v40_v10 = vld [vmem:[%s1824_s1 + $0x30] sm:$0xff]  ;;  %v41_v11 = vld [vmem:[%s1824_s1 + $0x38] sm:$0xff] }
   0x4   :  { %1259 = vmatprep.subr.bf16.mxu0 %v1258_v3  ;;  %1120 = vmatprep.mubr.f32.mxu0 %v1479_v9  ;;  %v1270_v12 = vpack.c.bf16 %v41_v11, %v40_v10  ;;  %v42_v13 = vld [vmem:[%s1824_s1 + $0x40] sm:$0xff]  ;;  %v43_v14 = vld [vmem:[%s1824_s1 + $0x48] sm:$0xff]  ;;  %v44_v16 = vld [vmem:[%s1824_s1 + $0x50] sm:$0xff]  ;;  %v1563_v4 = vsub.s32 0, %v1552_v63 }
   0x5   :  { %1261 = vmatpush3.bf16.msra.mxu0 %v1258_v3  ;;  %v1274_v15 = vpack.c.bf16 %v43_v14, %v42_v13  ;;  %v45_v17 = vld [vmem:[%s1824_s1 + $0x58] sm:$0xff]  ;;  %v46_v19 = vld [vmem:[%s1824_s1 + $0x60] sm:$0xff]  ;;  %v47_v20 = vld [vmem:[%s1824_s1 + $0x68] sm:$0xff] }
   0x6   :  { %1263 = vmatprep.subr.bf16.mxu0 %v1262_v5  ;;  %v1278_v18 = vpack.c.bf16 %v45_v17, %v44_v16  ;;  %v1282_v21 = vpack.c.bf16 %v47_v20, %v46_v19  ;;  %v48_v22 = vld [vmem:[%s1824_s1 + $0x70] sm:$0xff]  ;;  %v49_v23 = vld [vmem:[%s1824_s1 + $0x78] sm:$0xff]  ;;  %v1515_v25 = vld [vmem:[%s1825_s0 + $0x8] sm:$0xff] }
   0x7   :  { %v1286_v24 = vpack.c.bf16 %v49_v23, %v48_v22  ;;  %v134_v26 = vld [vmem:[%s1826_s3] sm:$0xff]  ;;  %v135_v27 = vld [vmem:[%s1826_s3 + $0x8] sm:$0xff]  ;;  %v136_v29 = vld [vmem:[%s1826_s3 + $0x10] sm:$0xff] }
   0x8   :  { %v1290_v28 = vpack.c.bf16 %v135_v27, %v134_v26  ;;  %v137_v30 = vld [vmem:[%s1826_s3 + $0x18] sm:$0xff]  ;;  %v138_v32 = vld [vmem:[%s1826_s3 + $0x20] sm:$0xff]  ;;  %v139_v33 = vld [vmem:[%s1826_s3 + $0x28] sm:$0xff]  ;;  %v270_v26 = vsub.s32 3, %v1552_v63 }
   0x9   :  { %1265 = vmatpush3.bf16.msra.mxu0 %v1262_v5  ;;  %v1294_v31 = vpack.c.bf16 %v137_v30, %v136_v29  ;;  %v140_v34 = vld [vmem:[%s1826_s3 + $0x30] sm:$0xff]  ;;  %v1298_v35 = vpack.c.bf16 %v139_v33, %v138_v32  ;;  %v141_v36 = vld [vmem:[%s1826_s3 + $0x38] sm:$0xff]  ;;  %v964_v38 = vld [vmem:[%s1827_s2] ss:$0 sm:$0xff]  ;;  %v263_v5 = vsub.s32 2, %v1552_v63 }
   0xa   :  { %1267 = vmatprep.subr.bf16.mxu0 %v1266_v8  ;;  %1291 = vmatprep.subr.bf16.mxu1 %v1290_v28  ;;  %v1302_v37 = vpack.c.bf16 %v141_v36, %v140_v34  ;;  %v965_v45 = vld [vmem:[%s1828_s4] ss:$0 sm:$0xff]  ;;  %v969_v2 = vld [vmem:[%s1829_s5 + $0x88] sm:$0xff]  ;;  %v970_v13 = vld [vmem:[%s1829_s5 + $0x90] sm:$0xff] }
   0xb   :  { %1293 = vmatpush3.bf16.msra.mxu1 %v1290_v28  ;;  %v968_v1 = vld [vmem:[%s1829_s5 + $0x80] sm:$0xff]  ;;  %v587_v7 = vld [vmem:[%s1829_s5 + $0x8] sm:$0xff]  ;;  %v971_v14 = vld [vmem:[%s1829_s5 + $0x98] sm:$0xff] }
   0xc   :  { %1295 = vmatprep.subr.bf16.mxu1 %v1294_v31  ;;  %v1307_v3 = vpack.c.bf16 %v969_v2, %v968_v1  ;;  %v586_v6 = vld [vmem:[%s1829_s5] sm:$0xff]  ;;  %v588_v19 = vld [vmem:[%s1829_s5 + $0x10] sm:$0xff]  ;;  %v589_v20 = vld [vmem:[%s1829_s5 + $0x18] sm:$0xff]  ;;  %v298_v2 = vsub.s32 7, %v1552_v63 }
   0xd   :  { %1269 = vmatpush3.bf16.msra.mxu0 %v1266_v8  ;;  %v1331_v10 = vpack.c.bf16 %v587_v7, %v586_v6  ;;  %v973_v22 = vld [vmem:[%s1829_s5 + $0xa8] sm:$0xff]  ;;  %v1334_v27 = vpack.c.bf16 %v589_v20, %v588_v19  ;;  %v590_v28 = vld [vmem:[%s1829_s5 + $0x20] sm:$0xff]  ;;  %v975_v32 = vld [vmem:[%s1829_s5 + $0xb8] sm:$0xff]  ;;  %v1407_v20 = vmov 1966171168  }
   0xe   :  { %1271 = vmatprep.subr.bf16.mxu0 %v1270_v12  ;;  %v591_v29 = vld [vmem:[%s1829_s5 + $0x28] sm:$0xff]  ;;  %v982_v6 = vld [vmem:[%s1829_s5 + $0xf0] sm:$0xff]  ;;  %v983_v7 = vld [vmem:[%s1829_s5 + $0xf8] sm:$0xff] }
   0xf   :  { %1297 = vmatpush3.bf16.msra.mxu1 %v1294_v31  ;;  %v974_v31 = vld [vmem:[%s1829_s5 + $0xb0] sm:$0xff]  ;;  %v1337_v33 = vpack.c.bf16 %v591_v29, %v590_v28 }
  0x10   :  { %1299 = vmatprep.subr.bf16.mxu1 %v1298_v35  ;;  %v1316_v34 = vpack.c.bf16 %v975_v32, %v974_v31 }
  0x11   :  { %1273 = vmatpush3.bf16.msra.mxu0 %v1270_v12 }
  0x12   :  { %1275 = vmatprep.subr.bf16.mxu0 %v1274_v15 }
  0x13   :  { %1301 = vmatpush3.bf16.msra.mxu1 %v1298_v35 }
  0x14   :  { %1303 = vmatprep.subr.bf16.mxu1 %v1302_v37 }
  0x15   :  { %1277 = vmatpush3.bf16.msra.mxu0 %v1274_v15  ;;  %v1310_v15 = vpack.c.bf16 %v971_v14, %v970_v13 }
  0x16   :  { %1279 = vmatprep.subr.bf16.mxu0 %v1278_v18 }
  0x17   :  { %1305 = vmatpush3.bf16.msra.mxu1 %v1302_v37  ;;  %v277_v37 = vsub.s32 4, %v1552_v63 }
  0x18   :  { %1306 = vmatprep.subr.bf16.mxu1 %v1404_v0 }
  0x19   :  { %1281 = vmatpush3.bf16.msra.mxu0 %v1278_v18  ;;  %v256_v18 = vsub.s32 1, %v1552_v63 }
  0x1a   :  { %1283 = vmatprep.subr.bf16.mxu0 %v1282_v21 }
  0x1d   :  { %1285 = vmatpush3.bf16.msra.mxu0 %v1282_v21  ;;  %v972_v21 = vld [vmem:[%s1829_s5 + $0xa0] sm:$0xff] }
  0x1e   :  { %1287 = vmatprep.subr.bf16.mxu0 %v1286_v24  ;;  %v1313_v30 = vpack.c.bf16 %v973_v22, %v972_v21  ;;  %v363_v21 = vunpack.c.l.s4 %v1407_v20 }
  0x20   :  { %v364_v22 = vunpack.c.0.s8 %v363_v21 }
  0x21   :  { %1289 = vmatpush3.bf16.msra.mxu0 %v1286_v24 }
  0x22   :  { %1330 = vmatprep.subr.bf16.mxu0 %v1404_v0 }
  0x24   :  { %1121 = vmatmul.mubr.f32.vlgmr.msra.gmra.mrb[0].mxu0 %v1515_v25 }
  0x25   :  { %1332 = vmatpush3.bf16.msra.mxu0 %v1331_v10  ;;  %v1328_v10 = vpack.c.bf16 %v983_v7, %v982_v6 }
  0x26   :  { %1333 = vmatprep.subr.bf16.mxu0 %v1404_v0 }
  0x29   :  { %1335 = vmatpush3.bf16.msra.mxu0 %v1334_v27 }
  0x2a   :  { %1336 = vmatprep.subr.bf16.mxu0 %v1404_v0 }
  0x2d   :  { %1338 = vmatpush3.bf16.msra.mxu0 %v1337_v33 }
  0x2e   :  { %1339 = vmatprep.subr.bf16.mxu0 %v1404_v0 }
  0xf7   :  { %v1122_v39 = vpop.f32.mrb[0].mxu0 }
  0xf8   :  { %v129_v40 = vadd.f32 %v1122_v39, %v964_v38  ;;  %v123_v41 = vpop.f32.mrb[1].mxu0  ;;  %v593_v39 = vld [vmem:[%s1829_s5 + $0x38] sm:$0xff] }
  0xf9   :  { %v124_v42 = vadd.f32 %v964_v38, %v123_v41  ;;  %v592_v38 = vld [vmem:[%s1829_s5 + $0x30] sm:$0xff]  ;;  %v977_v41 = vld [vmem:[%s1829_s5 + $0xc8] sm:$0xff] }
  0xfb   :  { %1390 = vtanh.f32 %v124_v42  ;;  %v1340_v42 = vpack.c.bf16 %v593_v39, %v592_v38 }
  0xfc   :  { %1392 = vtanh.f32 %v129_v40  ;;  %v976_v40 = vld [vmem:[%s1829_s5 + $0xc0] sm:$0xff] }
  0xfd   :  { %1341 = vmatpush3.bf16.msra.mxu0 %v1340_v42 }
  0xfe   :  { %1342 = vmatprep.subr.bf16.mxu0 %v1404_v0 }
 0x105   :  { %v1391_v43 = vpop.eup %1390 }
 0x106   :  { %v1393_v44 = vpop.eup %1392  ;;  %1139 = vmatprep.mubr.msk.f32.mxu1 %vm149_vm0, %v1391_v43  ;;  %v1319_v43 = vpack.c.bf16 %v977_v41, %v976_v40 }
 0x107   :  { %1140 = vmatmul.mubr.msk.f32.vlgmr.msra.gmra.mrb[0].mxu1 %vm149_vm0, %v1393_v44 }
 0x108   :  { %1308 = vmatpush3.bf16.msra.mxu1 %v1307_v3  ;;  %v598_v3 = vld [vmem:[%s1829_s5 + $0x60] sm:$0xff] }
 0x109   :  { %1309 = vmatprep.subr.bf16.mxu1 %v1404_v0 }
 0x10c   :  { %1311 = vmatpush3.bf16.msra.mxu1 %v1310_v15  ;;  %v600_v15 = vld [vmem:[%s1829_s5 + $0x70] sm:$0xff] }
 0x10d   :  { %1312 = vmatprep.subr.bf16.mxu1 %v1404_v0 }
 0x110   :  { %1314 = vmatpush3.bf16.msra.mxu1 %v1313_v30 }
 0x111   :  { %1315 = vmatprep.subr.bf16.mxu1 %v1404_v0 }
 0x114   :  { %1317 = vmatpush3.bf16.msra.mxu1 %v1316_v34 }
 0x115   :  { %1318 = vmatprep.subr.bf16.mxu1 %v1404_v0 }
 0x118   :  { %1320 = vmatpush3.bf16.msra.mxu1 %v1319_v43 }
 0x119   :  { %1321 = vmatprep.subr.bf16.mxu1 %v1404_v0 }
 0x1da   :  { %v1141_v46 = vpop.f32.mrb[0].mxu1 }
 0x1db   :  { %v228_v47 = vadd.f32 %v1141_v46, %v965_v45  ;;  %v222_v48 = vpop.f32.mrb[1].mxu1  ;;  %v284_v46 = vsub.s32 5, %v1552_v63 }
 0x1dc   :  { %v223_v49 = vadd.f32 %v965_v45, %v222_v48  ;;  %v595_v48 = vld [vmem:[%s1829_s5 + $0x48] sm:$0xff] }
 0x1dd   :  { %v233_v50 = vsel %vm231_vm1, %v228_v47, -inf }
 0x1de   :  { %v232_v51 = vsel %vm231_vm1, %v223_v49, -inf }
 0x1df   :  { %v234_v52 = vmax.f32 %v232_v51, %v233_v50  ;;  %v979_v50 = vld [vmem:[%s1829_s5 + $0xd8] sm:$0xff] }
 0x1e1   :  { %v235_v53 = vsub.f32 %v223_v49, %v234_v52  ;;  %v236_v54 = vsub.f32 %v228_v47, %v234_v52  ;;  %v594_v47 = vld [vmem:[%s1829_s5 + $0x40] sm:$0xff]  ;;  %v978_v49 = vld [vmem:[%s1829_s5 + $0xd0] sm:$0xff] }
 0x1e2   :  { %v1343_v51 = vpack.c.bf16 %v595_v48, %v594_v47  ;;  %v1322_v52 = vpack.c.bf16 %v979_v50, %v978_v49 }
 0x1e3   :  { %v237_v55 = vmul.f32 1.442695, %v235_v53  ;;  %v239_v56 = vmul.f32 1.442695, %v236_v54 }
 0x1e4   :  { %1344 = vmatpush3.bf16.msra.mxu0 %v1343_v51  ;;  %1323 = vmatpush3.bf16.msra.mxu1 %v1322_v52 }
 0x1e5   :  { %1394 = vpow2.f32 %v237_v55  ;;  %v291_v55 = vsub.s32 6, %v1552_v63  ;;  %1345 = vmatprep.subr.bf16.mxu0 %v1404_v0  ;;  %1324 = vmatprep.subr.bf16.mxu1 %v1404_v0 }
 0x1e6   :  { %1396 = vpow2.f32 %v239_v56  ;;  %v596_v56 = vld [vmem:[%s1829_s5 + $0x50] sm:$0xff] }
 0x1ef   :  { %v1395_v57 = vpop.eup %1394 }
 0x1f0   :  { %v1397_v58 = vpop.eup %1396  ;;  %v241_v59 = vsel %vm231_vm1, %v1395_v57, 0.0 }
 0x1f1   :  { %v242_v60 = vsel %vm231_vm1, %v1397_v58, 0.0 }
 0x1f2   :  { %v243_v61 = vadd.f32 %v242_v60, %v241_v59  ;;  %v981_v59 = vld [vmem:[%s1829_s5 + $0xe8] sm:$0xff] }
 0x1f4   :  { %1398 = vrcp.f32 %v243_v61 }
 0x1fe   :  { %v1399_v8 = vpop.eup %1398 }
 0x1ff   :  { %v1572_v11 = vmul.f32 %v1399_v8, %v1395_v57  ;;  %v1574_v12 = vmul.f32 %v1399_v8, %v1397_v58  ;;  %v597_v57 = vld [vmem:[%s1829_s5 + $0x58] sm:$0xff]  ;;  %v980_v58 = vld [vmem:[%s1829_s5 + $0xe0] sm:$0xff] }
 0x200   :  { %v1346_v60 = vpack.c.bf16 %v597_v57, %v596_v56  ;;  %v1325_v61 = vpack.c.bf16 %v981_v59, %v980_v58 }
 0x201   :  { %v264_v16 = vrot.slane %v1572_v11, %v263_v5  ;;  %v250_v17 = vrot.slane %v1572_v11, %v1563_v4  ;;  %v306_v23 = vrot.slane %v1574_v12, %v1563_v4  ;;  %v257_v24 = vrot.slane %v1572_v11, %v256_v18 }
 0x202   :  { %v271_v35 = vrot.slane %v1572_v11, %v270_v26  ;;  %v313_v36 = vrot.slane %v1574_v12, %v256_v18  ;;  %v278_v44 = vrot.slane %v1572_v11, %v277_v37  ;;  %v320_v45 = vrot.slane %v1574_v12, %v263_v5  ;;  %v599_v5 = vld [vmem:[%s1829_s5 + $0x68] sm:$0xff]  ;;  %1347 = vmatpush3.bf16.msra.mxu0 %v1346_v60 }
 0x203   :  { %266 = vbcast.lane.b32.xlu1 %v264_v16, 256  ;;  %252 = vbcast.lane.b32.xlu0 %v250_v17, 256  ;;  %v285_v53 = vrot.slane %v1572_v11, %v284_v46  ;;  %v327_v54 = vrot.slane %v1574_v12, %v270_v26  ;;  %v292_v62 = vrot.slane %v1572_v11, %v291_v55  ;;  %v601_v16 = vld [vmem:[%s1829_s5 + $0x78] sm:$0xff]  ;;  %v1406_v17 = vmov 0.0  }
 0x204   :  { %v334_v1 = vrot.slane %v1574_v12, %v277_v37  ;;  %1326 = vmatpush3.bf16.msra.mxu1 %v1325_v61  ;;  %v1349_v8 = vpack.c.bf16 %v599_v5, %v598_v3  ;;  %v299_v13 = vrot.slane %v1572_v11, %v298_v2  ;;  %v341_v14 = vrot.slane %v1574_v12, %v284_v46 }
 0x205   :  { %1348 = vmatprep.subr.bf16.mxu0 %v1404_v0  ;;  %1327 = vmatprep.subr.bf16.mxu1 %v1404_v0  ;;  %v1352_v11 = vpack.c.bf16 %v601_v16, %v600_v15  ;;  %v355_v18 = vrot.slane %v1574_v12, %v298_v2  ;;  %v348_v19 = vrot.slane %v1574_v12, %v291_v55 }
 0x206   :  { %1174 = vmatprep.mubr.msk.f32.mxu1 %vm1405_vm2, %v1406_v17  ;;  %1209 = vmatprep.mubr.msk.f32.mxu0 %vm1405_vm2, %v1406_v17  ;;  %v361_v12 = vcombine.high %v1479_v9, %v1479_v9 }
 0x207   :  { %308 = vbcast.lane.b32.xlu1 %v306_v23, 256  ;;  %259 = vbcast.lane.b32.xlu0 %v257_v24, 256  ;;  %v367_v23 = vsub.s32 %v364_v22, %v1552_v63  ;;  %v410_v63 = vcombine.high %v1515_v25, %v1515_v25 }
 0x208   :  { %1350 = vmatpush3.bf16.msra.mxu0 %v1349_v8  ;;  %1329 = vmatpush3.bf16.msra.mxu1 %v1328_v10 }
 0x209   :  { %1351 = vmatprep.subr.bf16.mxu0 %v1404_v0  ;;  %1354 = vmatprep.subr.bf16.mxu1 %v1404_v0  ;;  %v368_v24 = vrot.slane %v1479_v9, %v367_v23  ;;  %v417_v31 = vrot.slane %v1515_v25, %v367_v23  ;;  %v375_v34 = vrot.slane %v361_v12, %v367_v23 }
 0x20a   :  { %v424_v46 = vrot.slane %v410_v63, %v367_v23 }
 0x20b   :  { %273 = vbcast.lane.b32.xlu1 %v271_v35, 256  ;;  %315 = vbcast.lane.b32.xlu0 %v313_v36, 256  ;;  %v376_v26 = vcombine.high %v368_v24, %v368_v24  ;;  %v384_v30 = vrot.slane %v368_v24, %v367_v23  ;;  %v425_v32 = vcombine.high %v417_v31, %v417_v31 }
 0x20c   :  { %1353 = vmatpush3.bf16.msra.mxu0 %v1352_v11  ;;  %v433_v40 = vrot.slane %v417_v31, %v367_v23  ;;  %v377_v42 = vcombine.high %v375_v34, %v375_v34  ;;  %v426_v59 = vcombine.high %v424_v46, %v424_v46 }
 0x20d   :  { %1378 = vmatprep.subr.bf16.mxu0 %v1404_v0  ;;  %v398_v27 = vrot.slane %v376_v26, %v367_v23  ;;  %v406_v37 = vcombine.high %v384_v30, %v384_v30  ;;  %v462_v38 = vrot.slane %v384_v30, %v1563_v4  ;;  %v447_v41 = vrot.slane %v425_v32, %v367_v23 }
 0x20e   :  { %v455_v49 = vcombine.high %v433_v40, %v433_v40  ;;  %v405_v52 = vrot.slane %v377_v42, %v367_v23  ;;  %v454_v16 = vrot.slane %v426_v59, %v367_v23 }
 0x20f   :  { %280 = vbcast.lane.b32.xlu1 %v278_v44, 256  ;;  %322 = vbcast.lane.b32.xlu0 %v320_v45, 256  ;;  %v466_v33 = vrot.slane %v398_v27, %v1563_v4  ;;  %v408_v39 = vcombine.high %v398_v27, %v398_v27  ;;  %v391_v45 = vrot.slane %v375_v34, %v367_v23 }
 0x210   :  { %v470_v47 = vrot.slane %v406_v37, %v1563_v4  ;;  %v498_v51 = vrot.slane %v447_v41, %v1563_v4  ;;  %v409_v3 = vcombine.high %v405_v52, %v405_v52  ;;  %v482_v7 = vrot.slane %v405_v52, %v1563_v4 }
 0x211   :  { %v474_v50 = vrot.slane %v408_v39, %v1563_v4  ;;  %v478_v55 = vrot.slane %v391_v45, %v1563_v4  ;;  %v407_v58 = vcombine.high %v391_v45, %v391_v45  ;;  %v458_v31 = vcombine.high %v454_v16, %v454_v16 }
 0x212   :  { %v490_v22 = vrot.slane %v409_v3, %v1563_v4 }
 0x213   :  { %287 = vbcast.lane.b32.xlu1 %v285_v53, 256  ;;  %329 = vbcast.lane.b32.xlu0 %v327_v54, 256  ;;  %v457_v53 = vcombine.high %v447_v41, %v447_v41  ;;  %v494_v54 = vrot.slane %v433_v40, %v1563_v4  ;;  %v486_v15 = vrot.slane %v407_v58, %v1563_v4 }
 0x215   :  { %v506_v8 = vrot.slane %v457_v53, %v1563_v4 }
 0x217   :  { %294 = vbcast.lane.b32.xlu1 %v292_v62, 256  ;;  %336 = vbcast.lane.b32.xlu0 %v334_v1, 256  ;;  %v502_v62 = vrot.slane %v455_v49, %v1563_v4  ;;  %v440_v1 = vrot.slane %v424_v46, %v367_v23  ;;  %v514_v23 = vrot.slane %v454_v16, %v1563_v4 }
 0x219   :  { %v510_v20 = vrot.slane %v440_v1, %v1563_v4  ;;  %v456_v32 = vcombine.high %v440_v1, %v440_v1 }
 0x21b   :  { %301 = vbcast.lane.b32.xlu1 %v299_v13, 256  ;;  %343 = vbcast.lane.b32.xlu0 %v341_v14, 256 }
 0x21f   :  { %357 = vbcast.lane.b32.xlu1 %v355_v18, 256  ;;  %350 = vbcast.lane.b32.xlu0 %v348_v19, 256 }
 0x275   :  { %v267_v28 = vpop.permute.xlu1 %266  ;;  %v253_v29 = vpop.permute.xlu0 %252 }
 0x276   :  { %v539_v48 = vmul.f32 %v462_v38, %v253_v29  ;;  %v541_v60 = vmul.f32 %v470_v47, %v267_v28 }
 0x278   :  { %v556_v61 = vsel %vm555_vm3, %v539_v48, 0.0  ;;  %v559_v11 = vsel %vm555_vm3, %v541_v60, 0.0  ;;  %v984_v60 = vld [vmem:[%s1829_s5 + $0x100] sm:$0xff] }
 0x279   :  { %v309_v35 = vpop.permute.xlu1 %308  ;;  %v260_v36 = vpop.permute.xlu0 %259 }
 0x27a   :  { %v540_v9 = vmul.f32 %v466_v33, %v260_v36  ;;  %v547_v10 = vmul.f32 %v494_v54, %v309_v35 }
 0x27c   :  { %v557_v25 = vsel %vm555_vm3, %v540_v9, 0.0  ;;  %v571_v28 = vsel %vm555_vm3, %v547_v10, 0.0 }
 0x27d   :  { %v274_v43 = vpop.permute.xlu1 %273  ;;  %v316_v44 = vpop.permute.xlu0 %315  ;;  %v558_v2 = vadd.f32 %v557_v25, %v556_v61  ;;  %v985_v61 = vld [vmem:[%s1829_s5 + $0x108] sm:$0xff] }
 0x27e   :  { %v542_v5 = vmul.f32 %v474_v50, %v274_v43  ;;  %v548_v6 = vmul.f32 %v498_v51, %v316_v44  ;;  %v522_v43 = vrot.slane %v458_v31, %v1563_v4  ;;  %v518_v44 = vrot.slane %v456_v32, %v1563_v4  ;;  %v998_v32 = vld [vmem:[%s1829_s5 + $0x170] sm:$0xff] }
 0x27f   :  { %v560_v21 = vadd.f32 %v559_v11, %v558_v2 }
 0x280   :  { %v561_v24 = vsel %vm555_vm3, %v542_v5, 0.0  ;;  %v572_v26 = vsel %vm555_vm3, %v548_v6, 0.0  ;;  %v1355_v5 = vpack.c.bf16 %v985_v61, %v984_v60  ;;  %v986_v6 = vld [vmem:[%s1829_s5 + $0x110] sm:$0xff] }
 0x281   :  { %v281_v56 = vpop.permute.xlu1 %280  ;;  %v323_v57 = vpop.permute.xlu0 %322  ;;  %v562_v63 = vadd.f32 %v561_v24, %v560_v21  ;;  %v573_v37 = vadd.f32 %v572_v26, %v571_v28  ;;  %v990_v21 = vld [vmem:[%s1829_s5 + $0x130] sm:$0xff]  ;;  %v993_v26 = vld [vmem:[%s1829_s5 + $0x148] sm:$0xff]  ;;  %v995_v28 = vld [vmem:[%s1829_s5 + $0x158] sm:$0xff] }
 0x282   :  { %v543_v18 = vmul.f32 %v478_v55, %v281_v56  ;;  %v549_v19 = vmul.f32 %v502_v62, %v323_v57 }
 0x284   :  { %v563_v33 = vsel %vm555_vm3, %v543_v18, 0.0  ;;  %v574_v34 = vsel %vm555_vm3, %v549_v19, 0.0  ;;  %v988_v18 = vld [vmem:[%s1829_s5 + $0x120] sm:$0xff]  ;;  %v989_v19 = vld [vmem:[%s1829_s5 + $0x128] sm:$0xff] }
 0x285   :  { %v288_v13 = vpop.permute.xlu1 %287  ;;  %v330_v14 = vpop.permute.xlu0 %329  ;;  %v564_v40 = vadd.f32 %v563_v33, %v562_v63  ;;  %v575_v9 = vadd.f32 %v574_v34, %v573_v37  ;;  %v999_v33 = vld [vmem:[%s1829_s5 + $0x178] sm:$0xff]  ;;  %v870_v37 = vld [vmem:[%s1830_s7 + $0x10] sm:$0xff] }
 0x286   :  { %v544_v27 = vmul.f32 %v482_v7, %v288_v13  ;;  %v550_v12 = vmul.f32 %v506_v8, %v330_v14  ;;  %v987_v7 = vld [vmem:[%s1829_s5 + $0x118] sm:$0xff]  ;;  %v1376_v34 = vpack.c.bf16 %v999_v33, %v998_v32 }
 0x287   :  { %v1358_v16 = vpack.c.bf16 %v987_v7, %v986_v6 }
 0x288   :  { %v565_v38 = vsel %vm555_vm3, %v544_v27, 0.0  ;;  %v576_v39 = vsel %vm555_vm3, %v550_v12, 0.0  ;;  %v994_v12 = vld [vmem:[%s1829_s5 + $0x150] sm:$0xff] }
 0x289   :  { %v295_v29 = vpop.permute.xlu1 %294  ;;  %v337_v30 = vpop.permute.xlu0 %336  ;;  %v566_v49 = vadd.f32 %v565_v38, %v564_v40  ;;  %v577_v50 = vadd.f32 %v576_v39, %v575_v9  ;;  %v871_v38 = vld [vmem:[%s1830_s7 + $0x18] sm:$0xff] }
 0x28a   :  { %v545_v35 = vmul.f32 %v486_v15, %v295_v29  ;;  %v551_v36 = vmul.f32 %v510_v20, %v337_v30  ;;  %v1361_v20 = vpack.c.bf16 %v989_v19, %v988_v18  ;;  %v1370_v29 = vpack.c.bf16 %v995_v28, %v994_v12  ;;  %v996_v30 = vld [vmem:[%s1829_s5 + $0x160] sm:$0xff] }
 0x28b   :  { %v1382_v39 = vpack.c.bf16 %v871_v38, %v870_v37 }
 0x28c   :  { %v567_v45 = vsel %vm555_vm3, %v545_v35, 0.0  ;;  %v578_v46 = vsel %vm555_vm3, %v551_v36, 0.0  ;;  %v868_v35 = vld [vmem:[%s1830_s7] sm:$0xff]  ;;  %v869_v36 = vld [vmem:[%s1830_s7 + $0x8] sm:$0xff] }
 0x28d   :  { %v302_v41 = vpop.permute.xlu1 %301  ;;  %v344_v42 = vpop.permute.xlu0 %343  ;;  %v568_v52 = vadd.f32 %v567_v45, %v566_v49  ;;  %v579_v53 = vadd.f32 %v578_v46, %v577_v50  ;;  %v1379_v63 = vpack.c.bf16 %v869_v36, %v868_v35 }
 0x28e   :  { %v546_v47 = vmul.f32 %v490_v22, %v302_v41  ;;  %v552_v48 = vmul.f32 %v514_v23, %v344_v42  ;;  %v991_v22 = vld [vmem:[%s1829_s5 + $0x138] sm:$0xff]  ;;  %v997_v23 = vld [vmem:[%s1829_s5 + $0x168] sm:$0xff] }
 0x28f   :  { %v1364_v24 = vpack.c.bf16 %v991_v22, %v990_v21  ;;  %v1373_v31 = vpack.c.bf16 %v997_v23, %v996_v30 }
 0x290   :  { %v569_v25 = vsel %vm555_vm3, %v546_v47, 0.0  ;;  %v580_v51 = vsel %vm555_vm3, %v552_v48, 0.0  ;;  %v1001_v48 = vld [vmem:[%s1832_s8] ss:$0 sm:$0xff] }
 0x291   :  { %v358_v54 = vpop.permute.xlu1 %357  ;;  %v351_v55 = vpop.permute.xlu0 %350  ;;  %v570_v58 = vadd.f32 %v569_v25, %v568_v52  ;;  %v581_v4 = vadd.f32 %v580_v51, %v579_v53 }
 0x292   :  { %v554_v56 = vmul.f32 %v522_v43, %v358_v54  ;;  %v553_v57 = vmul.f32 %v518_v44, %v351_v55 }
 0x293   :  { %v621_v3 = vrot.slane %v570_v58, 1  ;;  %v785_v13 = vrot.slane %v570_v58, 2 }
 0x294   :  { %v582_v59 = vsel %vm555_vm3, %v553_v57, 0.0  ;;  %v584_v1 = vsel %vm555_vm3, %v554_v56, 0.0 }
 0x295   :  { %v583_v62 = vadd.f32 %v582_v59, %v581_v4 }
 0x297   :  { %v585_v2 = vadd.f32 %v584_v1, %v583_v62 }
 0x299   :  { %v623_v8 = vsel %vm622_vm4, %v585_v2, %v621_v3  ;;  %v695_v10 = vrot.slane %v585_v2, 7  ;;  %v786_v14 = vrot.slane %v585_v2, 1 }
 0x29a   :  { %1175 = vmatmul.mubr.f32.vlgmr.msra.gmra.mrb[2].mxu1 %v623_v8 }
 0x29b   :  { %1356 = vmatpush3.bf16.msra.mxu1 %v1355_v5  ;;  %v696_v15 = vsel %vm622_vm4, %v695_v10, %v570_v58  ;;  %1244 = vmatprep.mubr.msk.f32.mxu1 %vm1405_vm2, %v1406_v17  ;;  %v787_v11 = vsel %vm622_vm4, %v786_v14, %v785_v13 }
 0x29c   :  { %1210 = vmatmul.mubr.f32.vlgmr.msra.gmra.mrb[2].mxu0 %v696_v15  ;;  %1357 = vmatprep.subr.bf16.mxu1 %v1404_v0 }
 0x29d   :  { %1255 = vmatprep.mubr.msk.f32.mxu0 %vm1405_vm2, %v1406_v17  ;;  %v992_v17 = vld [vmem:[%s1829_s5 + $0x140] sm:$0xff]  ;;  %1380 = vmatpush3.bf16.msra.mxu0 %v1379_v63 }
 0x29e   :  { %v1367_v27 = vpack.c.bf16 %v993_v26, %v992_v17  ;;  %1381 = vmatprep.subr.bf16.mxu0 %v1404_v0 }
 0x29f   :  { %1359 = vmatpush3.bf16.msra.mxu1 %v1358_v16 }
 0x2a0   :  { %1360 = vmatprep.subr.bf16.mxu1 %v1404_v0 }
 0x2a1   :  { %1383 = vmatpush3.bf16.msra.mxu0 %v1382_v39 }
 0x2a3   :  { %1362 = vmatpush3.bf16.msra.mxu1 %v1361_v20 }
 0x2a4   :  { %1363 = vmatprep.subr.bf16.mxu1 %v1404_v0 }
 0x2a7   :  { %1365 = vmatpush3.bf16.msra.mxu1 %v1364_v24 }
 0x2a8   :  { %1366 = vmatprep.subr.bf16.mxu1 %v1404_v0 }
 0x2ab   :  { %1368 = vmatpush3.bf16.msra.mxu1 %v1367_v27 }
 0x2ac   :  { %1369 = vmatprep.subr.bf16.mxu1 %v1404_v0 }
 0x2af   :  { %1371 = vmatpush3.bf16.msra.mxu1 %v1370_v29 }
 0x2b0   :  { %1372 = vmatprep.subr.bf16.mxu1 %v1404_v0 }
 0x2b3   :  { %1374 = vmatpush3.bf16.msra.mxu1 %v1373_v31 }
 0x2b4   :  { %1375 = vmatprep.subr.bf16.mxu1 %v1404_v0  ;;  %v1000_v0 = vld [vmem:[%s1831_s6] ss:$0 sm:$0xff] }
 0x2b7   :  { %1377 = vmatpush3.bf16.msra.mxu1 %v1376_v34 }
 0x2ba   :  { %1245 = vmatmul.mubr.f32.vlgmr.msra.gmra.mrb[4].mxu1 %v787_v11 }
 0x36d   :  { %v691_v40 = vpop.f32.mrb[2].mxu1 }
 0x36e   :  { %v1176_v9 = vpop.f32.mrb[3].mxu1 }
 0x36f   :  { %v764_v41 = vpop.f32.mrb[2].mxu0 }
 0x370   :  { %v765_v42 = vadd.f32 %v764_v41, %v691_v40  ;;  %v1211_v43 = vpop.f32.mrb[3].mxu0 }
 0x38d   :  { %v855_v44 = vpop.f32.mrb[4].mxu1 }
 0x38e   :  { %v859_v45 = vadd.f32 %v855_v44, %v765_v42  ;;  %v1246_v46 = vpop.f32.mrb[5].mxu1 }
 0x390   :  { %v867_v47 = vadd.f32 %v1000_v0, %v859_v45 }
 0x392   :  { %1256 = vmatmul.mubr.msk.f32.vlgmr.msra.gmra.mrb[4].mxu0 %vm879_vm5, %v867_v47 }
 0x465   :  { %v949_v49 = vpop.f32.mrb[4].mxu0 }
 0x466   :  { %v950_v50 = vadd.f32 %v1001_v48, %v949_v49  ;;  %v1257_v25 = vpop.f32.mrb[5].mxu0 }
 0x468   :  { %v1003_v51 = vmul.f32 -1.442695, %v950_v50 }
 0x46a   :  { %1400 = vpow2.f32 %v1003_v51 }
 0x474   :  { %v1401_v52 = vpop.eup %1400 }
 0x475   :  { %v956_v53 = vadd.f32 1.0, %v1401_v52 }
 0x477   :  { %1402 = vrcp.f32 %v956_v53 }
 0x481   :  { %v1403_v54 = vpop.eup %1402 }
 0x482   :  { %959 = vst [vmem:[%s1833_s9] sm:$0x3] %v1403_v54 }

</bundles_post_ra>
